<compile_context>
chip_gen: v5e
topology: v5e:2x2
jax: 0.10.0
libtpu: 0.0.40
codegen_flags: <defaults>
</compile_context>

<pallas_src>
import math
from functools import partial

import jax
import jax.numpy as jnp
from jax.experimental import pallas as pl
from jax.experimental.pallas import tpu as pltpu


# ------------------------------ tiling helpers ------------------------------

def _pick_tile(dim, unit, max_tile):
    """Largest multiple of `unit` that divides `dim` and is <= max_tile.
    Falls back to the full extent (always a legal block size)."""
    if dim <= max_tile:
        return dim
    if dim % unit == 0:
        t = (max_tile // unit) * unit
        while t >= unit:
            if dim % t == 0:
                return t
            t -= unit
    return dim


def _pick_tiles(nc, hw, itemsize, row_tile, hw_tile, max_block_bytes=4 << 20):
    """Choose (row_tile, hw_tile) that divide (nc, hw), respect (8,128) tiling
    and keep a single block under ~4 MiB so double-buffering 3 operands fits
    comfortably under the scoped-VMEM limit on every chip (incl. v7x)."""
    tr = _pick_tile(nc, 8, row_tile)
    thw = _pick_tile(hw, 128, hw_tile)
    # If the hw axis fell back to the full (non-128-divisible) extent, shrink
    # the row tile instead; halving preserves divisibility of nc.
    while tr * thw * itemsize > max_block_bytes and tr % 16 == 0:
        tr //= 2
    return tr, thw


# ------------------------------- Pallas kernels -----------------------------

def _pool_kernel(x_ref, sum_ref, acc_ref):
    """Per-row (= per (n, c)) spatial sum, accumulated in f32 across the hw grid axis."""
    j = pl.program_id(1)

    @pl.when(j == 0)
    def _():
        acc_ref[...] = jnp.zeros_like(acc_ref)

    acc_ref[...] += jnp.sum(x_ref[...].astype(jnp.float32), axis=-1, keepdims=True)

    @pl.when(j == pl.num_programs(1) - 1)
    def _():
        sum_ref[...] = acc_ref[...]


def _eca_weight_kernel(pp_ref, w_ref, s_ref, *, k, inv_hw):
    """ECA gate: channel Conv1d(k, zero pad, no bias) of the pooled means -> sigmoid.

    pp_ref: (N, C + 2*pad) zero-padded per-(n,c) *sums* (mean folded in via inv_hw).
    w_ref : (k,) conv taps in SMEM.
    s_ref : (N, C) sigmoid gate, emitted in the activation dtype.
    Implemented as k shifted VPU FMAs (static slices) -- no dense (C, C) matmul.
    """
    c = s_ref.shape[-1]
    pp = pp_ref[...]
    y = w_ref[0] * pp[:, 0:c]
    for j in range(1, k):
        y = y + w_ref[j] * pp[:, j:j + c]
    s_ref[...] = jax.nn.sigmoid(y * inv_hw).astype(s_ref.dtype)


def _scale_kernel(x_ref, s_ref, o_ref):
    """o = x * per-row gate (gate broadcast along the lane/spatial axis)."""
    o_ref[...] = (x_ref[...] * s_ref[...]).astype(o_ref.dtype)


# --------------------------------- wrapper ----------------------------------

def eca_kernel_size(channel, b=1, gamma=2):
    k = int(abs((math.log(channel, 2) + b) / gamma))
    return k if k % 2 else k + 1


def eca_forward(x_nchw, w_taps, *, row_tile=256, hw_tile=2048):
    n, c, h, w = x_nchw.shape
    hw = h * w
    nc = n * c
    k = w_taps.shape[0]
    pad = (k - 1) // 2
    dtype = x_nchw.dtype

    x2d = x_nchw.reshape(nc, hw)                       # free reshape (contiguous), native dtype

    tr, thw = _pick_tiles(nc, hw, x2d.dtype.itemsize, row_tile, hw_tile)
    grid = (nc // tr, hw // thw)

    vmem_limit = 32 * 1024 * 1024

    # ---- pass 1: per-(n, c) spatial sums (grid-accumulated f32 reduction) ----
    sums = pl.pallas_call(
        _pool_kernel,
        out_shape=jax.ShapeDtypeStruct((nc, 1), jnp.float32),
        grid=grid,
        in_specs=[pl.BlockSpec((tr, thw), lambda i, j: (i, j))],
        out_specs=pl.BlockSpec((tr, 1), lambda i, j: (i, 0)),
        scratch_shapes=[pltpu.VMEM((tr, 1), jnp.float32)],
        compiler_params=pltpu.CompilerParams(
            dimension_semantics=("parallel", "arbitrary"),
            vmem_limit_bytes=vmem_limit),
    )(x2d)

    # ---- pass 2 (tiny): channel conv (k shifted FMAs) + mean + sigmoid ----
    pooled_padded = jnp.pad(sums.reshape(n, c), ((0, 0), (pad, pad)))
    s = pl.pallas_call(
        partial(_eca_weight_kernel, k=k, inv_hw=1.0 / hw),
        out_shape=jax.ShapeDtypeStruct((n, c), dtype),
        in_specs=[pl.BlockSpec(memory_space=pltpu.MemorySpace.VMEM),
                  pl.BlockSpec(memory_space=pltpu.MemorySpace.SMEM)],
        out_specs=pl.BlockSpec(memory_space=pltpu.MemorySpace.VMEM),
    )(pooled_padded, w_taps.astype(jnp.float32))

    # ---- pass 3: rescale x by its per-(n, c) gate (lane-dense loads/stores) ----
    out2d = pl.pallas_call(
        _scale_kernel,
        out_shape=jax.ShapeDtypeStruct((nc, hw), dtype),
        grid=grid,
        in_specs=[pl.BlockSpec((tr, thw), lambda i, j: (i, j)),
                  pl.BlockSpec((tr, 1), lambda i, j: (i, 0))],
        out_specs=pl.BlockSpec((tr, thw), lambda i, j: (i, j)),
        compiler_params=pltpu.CompilerParams(
            dimension_semantics=("parallel", "parallel"),
            vmem_limit_bytes=vmem_limit),
    )(x2d, s.reshape(nc, 1))

    return out2d.reshape(n, c, h, w)


# --------------------------- pure-JAX reference ----------------------------

def eca_reference(x_nchw, w_taps):
    n, c, h, w = x_nchw.shape
    k = w_taps.shape[0]
    pad = (k - 1) // 2
    pooled = x_nchw.astype(jnp.float32).mean(axis=(2, 3))            # (N, C)
    pp = jnp.pad(pooled, ((0, 0), (pad, pad)))
    y = sum(w_taps.astype(jnp.float32)[j] * pp[:, j:j + c] for j in range(k))
    s = jax.nn.sigmoid(y)
    return (x_nchw.astype(jnp.float32) * s[:, :, None, None]).astype(x_nchw.dtype)


if __name__ == "__main__":
    # small shapes; channels=8 gives the ECA formula kernel_size k=3
    n, c, h, w = 2, 8, 32, 32
    key = jax.random.PRNGKey(0)
    kx, kw = jax.random.split(key)
    x = jax.random.normal(kx, (n, c, h, w), jnp.float32)
    k = eca_kernel_size(c)
    w_taps = 0.5 * jax.random.normal(kw, (k,), jnp.float32)   # Conv1d(1,1,k,bias=False) weight

    fwd = jax.jit(partial(eca_forward, row_tile=8, hw_tile=512))  # small tiles to exercise the grid
    out = jax.block_until_ready(fwd(x, w_taps))
    assert out.shape == (n, c, h, w), out.shape
    assert out.dtype == x.dtype, out.dtype

    ref = eca_reference(x, w_taps)
    err = float(jnp.max(jnp.abs(out - ref)))
    assert jnp.allclose(out, ref, atol=1e-4, rtol=1e-4), f"max abs err={err}"

    print("KERNEL_OK")
</pallas_src>

<mosaic_0001>
module attributes {stable_mosaic.version = 11 : i64} {
  func.func @_pool_kernel(%arg0: i32, %arg1: i32, %arg2: memref<8x512xf32, #tpu.memory_space<vmem>>, %arg3: memref<8x1xf32, #tpu.memory_space<vmem>>, %arg4: memref<8x1xf32, #tpu.memory_space<vmem>>) attributes {dimension_semantics = [#tpu.dimension_semantics<parallel>, #tpu.dimension_semantics<arbitrary>], iteration_bounds = array<i64: 2, 2>, scalar_prefetch = 0 : i64, scratch_operands = 1 : i64, tpu.core_type = #tpu.core_type<tc>, window_params = [{transform_indices = @transform_0, window_bounds = array<i64: 8, 512>}, {transform_indices = @transform_1, window_bounds = array<i64: 8, 1>}]} {
    %c0_i32 = arith.constant 0 : i32
    %0 = arith.cmpi eq, %arg1, %c0_i32 : i32
    %1 = arith.extui %0 : i1 to i32
    %c0_i32_0 = arith.constant 0 : i32
    %2 = arith.cmpi ne, %1, %c0_i32_0 : i32
    scf.if %2 {
      %cst_7 = arith.constant 0.000000e+00 : f32
      %12 = vector.broadcast %cst_7 : f32 to vector<8x1xf32>
      %c0_8 = arith.constant 0 : index
      %c0_9 = arith.constant 0 : index
      %13 = vector.load %arg4[%c0_8, %c0_9] : memref<8x1xf32, #tpu.memory_space<vmem>>, vector<8x1xf32>
      tpu.vector_store %arg4[%c0_8, %c0_9], %12 {strides = array<i32>} : memref<8x1xf32, #tpu.memory_space<vmem>>, vector<8x1xf32>,
    } else {
    }
    %c0 = arith.constant 0 : index
    %c0_1 = arith.constant 0 : index
    %3 = vector.load %arg4[%c0, %c0_1] : memref<8x1xf32, #tpu.memory_space<vmem>>, vector<8x1xf32>
    %c0_2 = arith.constant 0 : index
    %c0_3 = arith.constant 0 : index
    %4 = vector.load %arg2[%c0_2, %c0_3] : memref<8x512xf32, #tpu.memory_space<vmem>>, vector<8x512xf32>
    %cst = arith.constant dense<0.000000e+00> : vector<8xf32>
    %5 = vector.multi_reduction <add>, %4, %cst [1] : vector<8x512xf32> to vector<8xf32>
    %6 = vector.shape_cast %5 : vector<8xf32> to vector<8x1xf32>
    %7 = arith.addf %3, %6 : vector<8x1xf32>
    %c0_4 = arith.constant 0 : index
    %c0_5 = arith.constant 0 : index
    %8 = vector.load %arg4[%c0_4, %c0_5] : memref<8x1xf32, #tpu.memory_space<vmem>>, vector<8x1xf32>
    tpu.vector_store %arg4[%c0_4, %c0_5], %7 {strides = array<i32>} : memref<8x1xf32, #tpu.memory_space<vmem>>, vector<8x1xf32>,
    %c1_i32 = arith.constant 1 : i32
    %9 = arith.cmpi eq, %arg1, %c1_i32 : i32
    %10 = arith.extui %9 : i1 to i32
    %c0_i32_6 = arith.constant 0 : i32
    %11 = arith.cmpi ne, %10, %c0_i32_6 : i32
    scf.if %11 {
      %c0_7 = arith.constant 0 : index
      %c0_8 = arith.constant 0 : index
      %12 = vector.load %arg4[%c0_7, %c0_8] : memref<8x1xf32, #tpu.memory_space<vmem>>, vector<8x1xf32>
      %c0_9 = arith.constant 0 : index
      %c0_10 = arith.constant 0 : index
      %13 = vector.load %arg3[%c0_9, %c0_10] : memref<8x1xf32, #tpu.memory_space<vmem>>, vector<8x1xf32>
      tpu.vector_store %arg3[%c0_9, %c0_10], %12 {strides = array<i32>} : memref<8x1xf32, #tpu.memory_space<vmem>>, vector<8x1xf32>,
    } else {
    }
    return
  }
  func.func @transform_0(%arg0: i32, %arg1: i32) -> (i32, i32) {
    %c0_i32 = arith.constant 0 : i32
    return %arg0, %arg1 : i32, i32
  }
  func.func @transform_1(%arg0: i32, %arg1: i32) -> (i32, i32) {
    %c0_i32 = arith.constant 0 : i32
    %c0_i32_0 = arith.constant 0 : i32
    return %arg0, %c0_i32 : i32, i32
  }
}

module attributes {stable_mosaic.version = 11 : i64} {
  func.func @_eca_weight_kernel(%arg0: memref<2x10xf32, #tpu.memory_space<vmem>>, %arg1: memref<3xf32, #tpu.memory_space<smem>>, %arg2: memref<2x8xf32, #tpu.memory_space<vmem>>) attributes {dimension_semantics = [], scalar_prefetch = 0 : i64, scratch_operands = 0 : i64, tpu.core_type = #tpu.core_type<tc>} {
    %c0 = arith.constant 0 : index
    %c0_0 = arith.constant 0 : index
    %0 = vector.load %arg0[%c0, %c0_0] : memref<2x10xf32, #tpu.memory_space<vmem>>, vector<2x10xf32>
    %c0_1 = arith.constant 0 : index
    %1 = memref.load %arg1[%c0_1] : memref<3xf32, #tpu.memory_space<smem>>
    %2 = vector.extract_strided_slice %0 {offsets = [0, 0], sizes = [2, 8], strides = [1, 1]} : vector<2x10xf32> to vector<2x8xf32>
    %3 = vector.broadcast %1 : f32 to vector<2x8xf32>
    %4 = arith.mulf %3, %2 : vector<2x8xf32>
    %c1 = arith.constant 1 : index
    %5 = memref.load %arg1[%c1] : memref<3xf32, #tpu.memory_space<smem>>
    %6 = vector.extract_strided_slice %0 {offsets = [0, 1], sizes = [2, 8], strides = [1, 1]} : vector<2x10xf32> to vector<2x8xf32>
    %7 = vector.broadcast %5 : f32 to vector<2x8xf32>
    %8 = arith.mulf %7, %6 : vector<2x8xf32>
    %9 = arith.addf %4, %8 : vector<2x8xf32>
    %c2 = arith.constant 2 : index
    %10 = memref.load %arg1[%c2] : memref<3xf32, #tpu.memory_space<smem>>
    %11 = vector.extract_strided_slice %0 {offsets = [0, 2], sizes = [2, 8], strides = [1, 1]} : vector<2x10xf32> to vector<2x8xf32>
    %12 = vector.broadcast %10 : f32 to vector<2x8xf32>
    %13 = arith.mulf %12, %11 : vector<2x8xf32>
    %14 = arith.addf %9, %13 : vector<2x8xf32>
    %cst = arith.constant 9.765625E-4 : f32
    %15 = vector.broadcast %cst : f32 to vector<2x8xf32>
    %16 = arith.mulf %14, %15 : vector<2x8xf32>
    %17 = arith.negf %16 : vector<2x8xf32>
    %18 = math.exp %17 : vector<2x8xf32>
    %cst_2 = arith.constant 1.000000e+00 : f32
    %19 = vector.broadcast %cst_2 : f32 to vector<2x8xf32>
    %20 = arith.addf %19, %18 : vector<2x8xf32>
    %21 = arith.divf %19, %20 : vector<2x8xf32>
    %c0_3 = arith.constant 0 : index
    %c0_4 = arith.constant 0 : index
    %22 = vector.load %arg2[%c0_3, %c0_4] : memref<2x8xf32, #tpu.memory_space<vmem>>, vector<2x8xf32>
    tpu.vector_store %arg2[%c0_3, %c0_4], %21 {strides = array<i32>} : memref<2x8xf32, #tpu.memory_space<vmem>>, vector<2x8xf32>,
    return
  }
}

module attributes {stable_mosaic.version = 11 : i64} {
  func.func @_scale_kernel(%arg0: i32, %arg1: i32, %arg2: memref<8x512xf32, #tpu.memory_space<vmem>>, %arg3: memref<8x1xf32, #tpu.memory_space<vmem>>, %arg4: memref<8x512xf32, #tpu.memory_space<vmem>>) attributes {dimension_semantics = [#tpu.dimension_semantics<parallel>, #tpu.dimension_semantics<parallel>], iteration_bounds = array<i64: 2, 2>, scalar_prefetch = 0 : i64, scratch_operands = 0 : i64, tpu.core_type = #tpu.core_type<tc>, window_params = [{transform_indices = @transform_0, window_bounds = array<i64: 8, 512>}, {transform_indices = @transform_1, window_bounds = array<i64: 8, 1>}, {transform_indices = @transform_2, window_bounds = array<i64: 8, 512>}]} {
    %c0 = arith.constant 0 : index
    %c0_0 = arith.constant 0 : index
    %0 = vector.load %arg2[%c0, %c0_0] : memref<8x512xf32, #tpu.memory_space<vmem>>, vector<8x512xf32>
    %c0_1 = arith.constant 0 : index
    %c0_2 = arith.constant 0 : index
    %1 = vector.load %arg3[%c0_1, %c0_2] : memref<8x1xf32, #tpu.memory_space<vmem>>, vector<8x1xf32>
    %2 = vector.broadcast %1 : vector<8x1xf32> to vector<8x512xf32>
    %3 = arith.mulf %0, %2 : vector<8x512xf32>
    %c0_3 = arith.constant 0 : index
    %c0_4 = arith.constant 0 : index
    %4 = vector.load %arg4[%c0_3, %c0_4] : memref<8x512xf32, #tpu.memory_space<vmem>>, vector<8x512xf32>
    tpu.vector_store %arg4[%c0_3, %c0_4], %3 {strides = array<i32>} : memref<8x512xf32, #tpu.memory_space<vmem>>, vector<8x512xf32>,
    return
  }
  func.func @transform_0(%arg0: i32, %arg1: i32) -> (i32, i32) {
    %c0_i32 = arith.constant 0 : i32
    return %arg0, %arg1 : i32, i32
  }
  func.func @transform_1(%arg0: i32, %arg1: i32) -> (i32, i32) {
    %c0_i32 = arith.constant 0 : i32
    %c0_i32_0 = arith.constant 0 : i32
    return %arg0, %c0_i32 : i32, i32
  }
  func.func @transform_2(%arg0: i32, %arg1: i32) -> (i32, i32) {
    %c0_i32 = arith.constant 0 : i32
    return %arg0, %arg1 : i32, i32
  }
}

</mosaic_0001>

<bundles_post_ra>
// kernel: eca_forward.3
= control target key start
LH: loop header
LB: loop body
LE: loop exit
PB: predicated region body
PF: predicated region fallthrough
CT: control target
= control target key end

     0   :  { %s343_s6 = smov 0   ;;  %s345_s7 = smov 0   ;;  %s399_s0 = inlined_call_operand.vmem [shape: f32[16,1024], index: 0, kind: input, shape index: {}]   ;;  %s400_s1 = inlined_call_operand.vmem [shape: f32[16,1], index: 1, kind: output, shape index: {}]  }
   0x1   :  { %s347_s8 = smov 0   ;;  %s349_s9 = smov 0  }
   0x2   :  { %s351_s10 = smov 0  }
   0x3 LB: > { %s20_s11 = sadd.s32 1, %s322_s8  ;;  %s23_s12 = sadd.s32 1, %s326_s9  ;;  %s330_s10 = sphi %s351_s10, %s11_s10   ;;  %s326_s9 = sphi %s349_s9, %s404_s9   ;;  %s322_s8 = sphi %s347_s8, %s403_s8   ;;  %s318_s7 = sphi %s345_s7, %s402_s7   ;;  %s314_s6 = sphi %s343_s6, %s401_s6  }
   0x4   : > { %p21_p0 = scmp.ge.s32.totalorder %s20_s11, 2  ;;  %p242_p1 = scmp.ge.s32.totalorder %s330_s10, 1 }
   0x5   : > { %p106_p2 = scmp.lt.s32.totalorder %s330_s10, 5 }
   0x6   : > { %s406_s11 = smov (%p21_p0, %s20_s11), 0  ;;  %s408_s12 = smov (!%p21_p0, %s23_s12), %s326_s9 }
   0x7   : > { %p107_p3 = pnand %p242_p1, %p106_p2  ;;  %p25_p4 = scmp.ge.s32.totalorder %s408_s12, 2 }
   0x8   : > { %s243_s13 = sshll.u32 (!%p107_p3), %s314_s6, 2  ;;  %p130_p5 = scmp.lt.s32.totalorder (!%p107_p3), %s318_s7, 1 }
   0x9   : > { %s410_s12 = smov (%p25_p4, %s408_s12), 0  ;;  %110 = sbr.rel (%p107_p3) target bundleno = 156 (0x9c), region = 24 }
   0xa   : > { %p132_p6 = scmp.lt.s32.totalorder (!%p107_p3), %s243_s13, 7  ;;  %p247_p7 = scmp.ne.s32.totalorder (!%p107_p3), %s314_s6, 0 }
   0xe   : > { %s412_s7 = smov (!%p130_p5, %s318_s7), 1  ;;  %s414_s13 = smov (!%p132_p6, %s243_s13), 7 }
   0xf   : > { %s244_s14 = sshll.u32 %s412_s7, 3  ;;  %146 = sbr.rel (%p247_p7) target bundleno = 22 (0x16), region = 28 }
  0x10   : > { %s135_s15 = sadd.s32 %s244_s14, %s414_s13  ;;  %s142_s18 = scalar_lea.vmem %s400_s1, %s244_s14 }
  0x11   : > { %s245_s19 = sshll.u32 %s135_s15, 3 }
  0x12   : > { %s137_s22 = scalar_lea.vmem %s399_s0, %s245_s19 }
  0x14   : > { %vm147_vm0 = vcmask 7168   ;;  %v332_v0 = vmov 0.0  }
  0x15   : > { %148 = vst.msk [vmem:[#allocation2] sm:$0xff] %vm147_vm0, %v332_v0 }
  0x16 PF: > { %v150_v1 = vld [vmem:[%s137_s22] sm:$0xff]  ;;  %v151_v2 = vld [vmem:[%s137_s22 + $0x8] sm:$0xff]  ;;  %v152_v3 = vld [vmem:[%s137_s22 + $0x10] sm:$0xff]  ;;  %vm160_vm1 = vcmask 7168   ;;  %p248_p8 = scmp.ne.s32.totalorder %s314_s6, 1 }
  0x17   : > { %v154_v4 = vadd.f32 %v151_v2, %v150_v1  ;;  %v153_v5 = vld [vmem:[%s137_s22 + $0x18] sm:$0xff] }
  0x19   : > { %v155_v6 = vadd.f32 %v154_v4, %v152_v3 }
  0x1b   : > { %v156_v7 = vadd.f32 %v155_v6, %v153_v5 }
  0x1c   : > { %v149_v8 = vld [vmem:[#allocation2] sm:$0xff] }
  0x1d   : > { %157 = vadd.xlane.f32.xlu0 %v156_v7 }
  0x8f   : > { %165 = sbr.rel (%p248_p8) target bundleno = 156 (0x9c), region = 32 }
  0x90   : > { %v158_v9 = vpop.xlane.xlu0 %157 }
  0x91   : > { %v159_v10 = vadd.f32 %v158_v9, %v149_v8 }
  0x93   : > { %161 = vst.msk [vmem:[#allocation2] sm:$0xff] %vm160_vm1, %v159_v10 }
  0x9a   : > { %v166_v11 = vld [vmem:[#allocation2] sm:$0xff] }
  0x9b   : > { %167 = vst.msk [vmem:[%s142_s18] sm:$0xff] %vm160_vm1, %v166_v11 }
  0x9c PF: > { %s11_s10 = sadd.s32 1, %s330_s10   ;;  %s401_s6 = smov %s322_s8 }
  0x9d   : > { %p8_p9 = scmp.ge.s32.totalorder %s11_s10, 6   ;;  %s402_s7 = smov %s326_s9 }
  0x9e   : > { %s403_s8 = smov %s406_s11  ;;  %s404_s9 = smov %s410_s12 }
  0x9f   :  { %10 = sbr.rel (!%p8_p9) target bundleno = 3 (0x3), region = 62 }

// kernel: eca_forward.4
= control target key start
LH: loop header
LB: loop body
LE: loop exit
PB: predicated region body
PF: predicated region fallthrough
CT: control target
= control target key end

     0   :  { %7 = vsyncpa [#allocation3], 0  ;;  %s95_s12 = smov [#allocation2]   ;;  %s122_s0 = inlined_call_operand.vmem [shape: f32[2,10], index: 0, kind: input, shape index: {}]   ;;  %s123_s1 = inlined_call_operand.vmem [shape: f32[3], index: 1, kind: input, shape index: {}]   ;;  %s124_s2 = inlined_call_operand.vmem [shape: f32[2,8], index: 2, kind: output, shape index: {}]  }
   0x1   :  { %s15_s11 = sshll.u32 %s123_s1, 4  ;;  %s16_s11 = int_to_ptr.vmem [resolvable:$true] %s15_s11 }
   0x2   :  { %18 = dma.vmem_to_smem %s16_s11, 16, %s95_s12, [#allocation3]  }
   0x3   :  { %93 = dma.done.wait [#allocation3], 16  }
   0x4   :  { %94 = vsyncadd [#allocation3], 4294967280 }
   0x5   :  { %23 = sfence }
   0x6   :  { %s71_s13 = sld [smem:[#allocation2 + $0x1]]  ;;  %v24_v0 = vld [vmem:[%s122_s0] sm:$0x3]  ;;  %s96_s17 = smov 127   ;;  %vm64_vm2 = vcmask 58368  }
   0x7   :  { %s72_s14 = sld [smem:[#allocation2 + $0x2]]  ;;  %s97_s18 = smov 126  }
   0x8   :  { %s25_s1 = sld [smem:[#allocation2]] }
   0xc   :  { %v29_v1 = vstv %s71_s13 }
   0xd   :  { %v30_v2 = vmul.f32 %v29_v1, %v24_v0  ;;  %v37_v3 = vstv %s72_s14 }
   0xe   :  { %v38_v4 = vmul.f32 %v37_v3, %v24_v0  ;;  %v26_v5 = vstv %s25_s1 }
   0xf   :  { %32 = vrot.lane.b32.xlu0 %v30_v2, %s96_s17  ;;  %v27_v7 = vmul.f32 %v26_v5, %v24_v0 }
  0x17   :  { %40 = vrot.lane.b32.xlu0 %v38_v4, %s97_s18 }
  0x81   :  { %v33_v6 = vpop.permute.xlu0 %32 }
  0x82   :  { %v35_v8 = vadd.f32 %v33_v6, %v27_v7 }
  0x89   :  { %v41_v9 = vpop.permute.xlu0 %40 }
  0x8a   :  { %v43_v10 = vadd.f32 %v41_v9, %v35_v8 }
  0x8c   :  { %v73_v11 = vmul.f32 -0.0009765625, %v43_v10 }
  0x8e   :  { %v46_v12 = vmul.f32 1.442695, %v73_v11 }
  0x90   :  { %77 = vpow2.f32 %v46_v12 }
  0x96   :  { %v78_v13 = vpop.eup %77 }
  0x97   :  { %v48_v14 = vadd.f32 1.0, %v78_v13 }
  0x99   :  { %79 = vrcp.f32 %v48_v14  ;;  %v60_v18 = vand.u32 2147483648, %v48_v14  ;;  %v58_v20 = vand.u32 2147483647, %v48_v14  ;;  %vm54_vm1 = vweird.f32 %v48_v14 }
  0x9b   :  { %v61_v22 = vor.u32 1.1754944e-38, %v60_v18  ;;  %vm59_vm4 = vcmp.eq.f32.partialorder %v58_v20, 8.507059e+37 }
  0x9f   :  { %v80_v15 = vpop.eup %79 }
  0xa0   :  { %v50_v16 = vmul.f32 %v80_v15, %v48_v14  ;;  %vm55_vm0 = vweird.f32 %v80_v15 }
  0xa1   :  { %vm56_vm3 = vmor %vm54_vm1, %vm55_vm0 }
  0xa2   :  { %v51_v17 = vsub.f32 1.0, %v50_v16 }
  0xa4   :  { %v52_v19 = vmul.f32 %v80_v15, %v51_v17 }
  0xa6   :  { %v53_v21 = vadd.f32 %v80_v15, %v52_v19 }
  0xa8   :  { %v57_v23 = vsel %vm56_vm3, %v80_v15, %v53_v21 }
  0xa9   :  { %v62_v24 = vsel %vm59_vm4, %v61_v22, %v57_v23 }
  0xaa   :  { %65 = vst.msk [vmem:[%s124_s2] sm:$0x3] %vm64_vm2, %v62_v24 }
  0xab   :  { %70 = vsyncpa [#allocation3], 1 }

// kernel: eca_forward.5
= control target key start
LH: loop header
LB: loop body
LE: loop exit
PB: predicated region body
PF: predicated region fallthrough
CT: control target
= control target key end

     0   :  { %s432_s9 = smov 0   ;;  %s434_s10 = smov 0   ;;  %s486_s0 = inlined_call_operand.vmem [shape: f32[16,1024], index: 0, kind: input, shape index: {}]   ;;  %s487_s1 = inlined_call_operand.vmem [shape: f32[16,1], index: 1, kind: input, shape index: {}]   ;;  %s488_s2 = inlined_call_operand.vmem [shape: f32[16,1024], index: 2, kind: output, shape index: {}]  }
   0x1   :  { %s436_s11 = smov 0   ;;  %s438_s12 = smov 0  }
   0x2   :  { %s440_s13 = smov 0  }
   0x3 LB: > { %s21_s14 = sadd.s32 1, %s406_s11  ;;  %s24_s15 = sadd.s32 1, %s410_s12  ;;  %s414_s13 = sphi %s440_s13, %s12_s13   ;;  %s410_s12 = sphi %s438_s12, %s492_s12   ;;  %s406_s11 = sphi %s436_s11, %s491_s11   ;;  %s402_s10 = sphi %s434_s10, %s490_s10   ;;  %s398_s9 = sphi %s432_s9, %s489_s9  }
   0x4   : > { %p22_p0 = scmp.ge.s32.totalorder %s21_s14, 2  ;;  %p324_p1 = scmp.ge.s32.totalorder %s414_s13, 1 }
   0x5   : > { %p142_p2 = scmp.lt.s32.totalorder %s414_s13, 5 }
   0x6   : > { %s494_s14 = smov (%p22_p0, %s21_s14), 0  ;;  %s496_s15 = smov (!%p22_p0, %s24_s15), %s410_s12 }
   0x7   : > { %p143_p3 = pnand %p324_p1, %p142_p2  ;;  %p26_p4 = scmp.ge.s32.totalorder %s496_s15, 2 }
   0x8   : > { %p177_p5 = scmp.lt.s32.totalorder (!%p143_p3), %s402_s10, 1  ;;  %s325_s20 = sshll.u32 (!%p143_p3), %s398_s9, 2 }
   0x9   : > { %s498_s15 = smov (%p26_p4, %s496_s15), 0  ;;  %146 = sbr.rel (%p143_p3) target bundleno = 139 (0x8b), region = 28 }
   0xa   : > { %p179_p6 = scmp.lt.s32.totalorder (!%p143_p3), %s325_s20, 7 }
   0xe   : > { %v416_v0 = vmov 0   ;;  %s500_s10 = smov (!%p177_p5, %s402_s10), 1  ;;  %s502_s20 = smov (!%p179_p6, %s325_s20), 7 }
   0xf   : > { %375 = vset.pattern.permute.xlu0 %v416_v0  ;;  %s326_s16 = sshll.u32 %s500_s10, 3 }
  0x10   : > { %s189_s19 = scalar_lea.vmem %s487_s1, %s326_s16  ;;  %s182_s21 = sadd.s32 %s326_s16, %s502_s20 }
  0x11   : > { %v204_v1 = vld [vmem:[%s189_s19] sm:$0xff]  ;;  %s327_s22 = sshll.u32 %s182_s21, 3 }
  0x12   : > { %207 = vperm.xlu0 %375, %v204_v1   ;;  %s184_s25 = scalar_lea.vmem %s486_s0, %s327_s22  ;;  %s198_s28 = scalar_lea.vmem %s488_s2, %s327_s22 }
  0x13   : > { %v200_v2 = vld [vmem:[%s184_s25] sm:$0xff]  ;;  %v201_v3 = vld [vmem:[%s184_s25 + $0x8] sm:$0xff]  ;;  %v202_v4 = vld [vmem:[%s184_s25 + $0x10] sm:$0xff] }
  0x14   : > { %v203_v5 = vld [vmem:[%s184_s25 + $0x18] sm:$0xff] }
  0x84   : > { %v208_v6 = vpop.permute.xlu0 %207 }
  0x85   : > { %v210_v7 = vmul.f32 %v208_v6, %v200_v2  ;;  %v211_v8 = vmul.f32 %v208_v6, %v201_v3  ;;  %v212_v9 = vmul.f32 %v208_v6, %v202_v4  ;;  %v213_v10 = vmul.f32 %v208_v6, %v203_v5 }
  0x87   : > { %214 = vst [vmem:[%s198_s28] sm:$0xff] %v210_v7 }
  0x88   : > { %215 = vst [vmem:[%s198_s28 + $0x8] sm:$0xff] %v211_v8 }
  0x89   : > { %216 = vst [vmem:[%s198_s28 + $0x10] sm:$0xff] %v212_v9 }
  0x8a   : > { %217 = vst [vmem:[%s198_s28 + $0x18] sm:$0xff] %v213_v10 }
  0x8b PF: > { %s12_s13 = sadd.s32 1, %s414_s13   ;;  %s489_s9 = smov %s406_s11 }
  0x8c   : > { %p9_p7 = scmp.ge.s32.totalorder %s12_s13, 6   ;;  %s490_s10 = smov %s410_s12 }
  0x8d   : > { %s491_s11 = smov %s494_s14  ;;  %s492_s12 = smov %s498_s15 }
  0x8e   :  { %11 = sbr.rel (!%p9_p7) target bundleno = 3 (0x3), region = 61 }

</bundles_post_ra>
